<compile_context>
chip_gen: v7x
topology: tpu7x:2x2x1
jax: 0.10.0
libtpu: 0.0.40
codegen_flags: <defaults>
</compile_context>

<pallas_src>
import functools

import jax
import jax.numpy as jnp
from jax.experimental import pallas as pl
from jax.experimental.pallas import tpu as pltpu


# ------------------------------ fused kernel --------------------------------

def _dps_fused_kernel(cols_ref, noise_ref, patches_ref, w108_ref, wexp_ref,
                      featb_ref, headw_ref, headb_ref, out_ref,
                      *, k, sigma, taps):
    # ---- scorer: 3x3 valid conv as a 27-tap VPU MAC, fused with 2x2 maxpool ----
    # cols_ref: (1, 4*taps, D) rows grouped as (pool-subposition q, tap t),
    # columns are the D pooled score cells (lane-dense).
    cols = cols_ref[0]                                   # (4*taps, D) f32
    w = w108_ref[...]                                    # (4*taps, 1) f32
    prod = cols * w                                      # (4*taps, D)
    sub = []
    for q in range(4):                                   # 4 positions of the 2x2 pool
        sub.append(jnp.sum(prod[q * taps:(q + 1) * taps], axis=0, keepdims=True))
    s = jnp.maximum(jnp.maximum(sub[0], sub[1]),
                    jnp.maximum(sub[2], sub[3]))         # (1, D) pooled conv scores
    # NOTE: the scorer conv bias is omitted on purpose — a constant shift cancels
    # exactly under the min-max normalization below (identical downstream output).

    # ---- min-max normalization (as in the PyTorch forward) ----
    smin = jnp.min(s, axis=-1, keepdims=True)
    smax = jnp.max(s, axis=-1, keepdims=True)
    sn = (s - smin) / (smax - smin + 1e-5)               # (1, D)

    # ---- perturbed top-k (no (S,D,D) tensor: k-th-largest threshold per sample) ----
    noise = noise_ref[0]                                 # (S, D)
    p = sn + noise * sigma                               # perturbed scores (S, D)
    r = p
    thresh = None
    for _ in range(k):                                   # iterative max -> k-th largest
        thresh = jnp.max(r, axis=-1, keepdims=True)
        r = jnp.where(r >= thresh, -1e30, r)
    # top-k membership (ties are measure-zero thanks to the Gaussian noise)
    intop = (p >= thresh).astype(jnp.float32)            # (S, D)

    # slot of a member d = #{e < d : e in top-k}  (== sorted-index position)
    D = p.shape[-1]
    rows = jax.lax.broadcasted_iota(jnp.int32, (D, D), 0)
    cols_i = jax.lax.broadcasted_iota(jnp.int32, (D, D), 1)
    tri = (rows < cols_i).astype(jnp.float32)            # strict lower-index mask
    prefix = jnp.dot(intop, tri, preferred_element_type=jnp.float32)   # (S, D)

    parts = []
    for slot in range(k):
        sel = intop * (jnp.abs(prefix - float(slot)) < 0.5).astype(jnp.float32)
        parts.append(jnp.mean(sel, axis=0, keepdims=True))              # (1, D)
    indicators = jnp.concatenate(parts, axis=0)          # (k, D) soft one-hot means

    # ---- differentiable patch aggregation (MXU, bf16 operands / f32 accumulate) ----
    patches = patches_ref[0]                             # (D, c*P*P) bf16
    pf = jnp.dot(indicators.astype(jnp.bfloat16), patches,
                 preferred_element_type=jnp.float32)     # (k, c*P*P)

    # ---- feature net: per-patch mean-pool folded into Wexp + linear projection ----
    feats = jnp.dot(pf.astype(jnp.bfloat16), wexp_ref[...],
                    preferred_element_type=jnp.float32) + featb_ref[...]  # (k, dm)

    # TODO(synk): Transformer definition not provided in the source; identity here.

    # ---- head: Linear(d_model, n_class) + Softmax, class dim padded to 128 lanes ----
    logits = jnp.dot(feats.astype(jnp.bfloat16), headw_ref[...],
                     preferred_element_type=jnp.float32) + headb_ref[...]  # (k, 128)
    m = jnp.max(logits, axis=-1, keepdims=True)
    e = jnp.exp(logits - m)                              # padded lanes -> exp(-1e9) == 0
    out_ref[0] = e / jnp.sum(e, axis=-1, keepdims=True)


# ------------------------------ model (glue) --------------------------------

def init_params(key, n_channel, d_model, n_class):
    k1, k2, k3 = jax.random.split(key, 3)
    return dict(
        scorer_w=0.1 * jax.random.normal(k1, (1, n_channel, 3, 3), jnp.float32),
        scorer_b=jnp.zeros((1,), jnp.float32),
        feat_w=0.1 * jax.random.normal(k2, (n_channel, d_model), jnp.float32),
        feat_b=jnp.zeros((d_model,), jnp.float32),
        head_w=0.1 * jax.random.normal(k3, (d_model, n_class), jnp.float32),
        head_b=jnp.zeros((n_class,), jnp.float32),
    )


def dps_forward(params, x_high, x_low, noise, cfg):
    b, c, H, W = x_high.shape
    P = cfg['patch_size']
    k = cfg['k']
    h_s, w_s = cfg['score_size']
    D = h_s * w_s
    scale_h, scale_w = H // h_s, W // w_s
    S = noise.shape[1]

    # --- scorer im2col, grouped by pooled cell (conv + 2x2 maxpool fuse in-kernel) ---
    # TODO(synk): resnet18 trunk used inside Scorer is not provided in the source;
    # replaced by a single 3x3 valid conv on x_low followed by the 2x2 max pool.
    cl, Hl, Wl = x_low.shape[1], x_low.shape[2], x_low.shape[3]
    Ho, Wo = Hl - 2, Wl - 2
    assert Ho == 2 * h_s and Wo == 2 * w_s, "low-res input must yield 2*score_size conv map"
    taps = cl * 9
    tap_list = []
    for cin in range(cl):
        for dy in range(3):
            for dx in range(3):
                tap_list.append(x_low[:, cin, dy:dy + Ho, dx:dx + Wo])
    tp = jnp.stack(tap_list, axis=-1)                          # (b, Ho, Wo, taps)
    tp = tp.reshape(b, h_s, 2, w_s, 2, taps)                   # (b, di, qy, dj, qx, t)
    cols = tp.transpose(0, 2, 4, 5, 1, 3).reshape(b, 4 * taps, D)   # (b, 4*taps, D)
    w108 = jnp.tile(params['scorer_w'].reshape(taps), (4,)).reshape(4 * taps, 1)

    # --- all D patch windows, flattened to (b, D, c*P*P), bf16 for the MXU ---
    padded_h = scale_h * h_s + P - 1
    padded_w = scale_w * w_s + P - 1
    top_pad = (P - scale_h) // 2
    left_pad = (P - scale_w) // 2
    bottom_pad = padded_h - top_pad - H
    right_pad = padded_w - left_pad - W
    x_pad = jnp.pad(x_high, ((0, 0), (0, 0),
                             (top_pad, bottom_pad), (left_pad, right_pad)))
    slabs = []
    for i in range(h_s):
        for j in range(w_s):
            sh, sw = i * scale_h, j * scale_w
            slabs.append(x_pad[:, :, sh:sh + P, sw:sw + P])
    all_patches = jnp.stack(slabs, axis=1).reshape(b, D, c * P * P).astype(jnp.bfloat16)
    # TODO(synk): at real DPS sizes (P >> stride) this duplicates x_pad ~P^2/stride^2
    # times; DMA the D windows from HBM inside the kernel (memory_space=pl.ANY +
    # make_async_copy, D tiled as an "arbitrary" reduction axis) instead of stacking.

    # --- weights: mean-pool folded into Wexp; head padded to 128 lanes (lane-dense) ---
    # TODO(synk): resnet18 feature_net not provided; replaced by per-patch global
    # mean-pool + linear projection to d_model (folded into a single matmul weight).
    dm = params['feat_w'].shape[1]
    n_class = params['head_w'].shape[1]
    CPAD = 128
    wexp = (jnp.repeat(params['feat_w'], P * P, axis=0) / float(P * P)).astype(jnp.bfloat16)
    featb = params['feat_b'].reshape(1, dm)
    headw = jnp.zeros((dm, CPAD), jnp.float32).at[:, :n_class].set(
        params['head_w']).astype(jnp.bfloat16)
    headb = jnp.full((1, CPAD), -1e9, jnp.float32).at[0, :n_class].set(params['head_b'])

    kern = functools.partial(_dps_fused_kernel, k=k, sigma=cfg['sigma'], taps=taps)
    out = pl.pallas_call(
        kern,
        out_shape=jax.ShapeDtypeStruct((b, k, CPAD), jnp.float32),
        grid=(b,),
        in_specs=[
            pl.BlockSpec((1, 4 * taps, D), lambda i: (i, 0, 0)),      # scorer im2col
            pl.BlockSpec((1, S, D), lambda i: (i, 0, 0)),             # noise
            pl.BlockSpec((1, D, c * P * P), lambda i: (i, 0, 0)),     # patch windows
            pl.BlockSpec((4 * taps, 1), lambda i: (0, 0)),            # conv weights
            pl.BlockSpec((c * P * P, dm), lambda i: (0, 0)),          # feature weight
            pl.BlockSpec((1, dm), lambda i: (0, 0)),                  # feature bias
            pl.BlockSpec((dm, CPAD), lambda i: (0, 0)),               # head weight (padded)
            pl.BlockSpec((1, CPAD), lambda i: (0, 0)),                # head bias (padded)
        ],
        out_specs=pl.BlockSpec((1, k, CPAD), lambda i: (i, 0, 0)),
        compiler_params=pltpu.CompilerParams(
            dimension_semantics=("parallel",)),                       # 2-TC shard on v7x
    )(cols, noise, all_patches, w108, wexp, featb, headw, headb)

    return out[:, :, :n_class].reshape(b, k * n_class)


# --------------------------------- main --------------------------------------

if __name__ == "__main__":
    key = jax.random.PRNGKey(0)
    kp, khigh, klow, knoise = jax.random.split(key, 4)

    cfg = dict(n_class=5, n_channel=3, high_size=(32, 32), score_size=(4, 4),
               k=3, num_samples=64, sigma=0.05, patch_size=8, d_model=32)

    params = init_params(kp, cfg['n_channel'], cfg['d_model'], cfg['n_class'])

    b = 2
    x_high = jax.random.normal(khigh, (b, cfg['n_channel'],
                                       cfg['high_size'][0], cfg['high_size'][1]),
                               jnp.float32)
    # low-res input sized so the simplified scorer yields a (h_score, w_score) map
    x_low = jax.random.normal(klow, (b, cfg['n_channel'], 10, 10), jnp.float32)

    D = cfg['score_size'][0] * cfg['score_size'][1]
    noise = jax.random.normal(knoise, (b, cfg['num_samples'], D), jnp.float32)

    pred = dps_forward(params, x_high, x_low, noise, cfg)
    pred = jax.block_until_ready(pred)
    assert pred.shape == (b, cfg['k'] * cfg['n_class'])
    assert bool(jnp.all(jnp.isfinite(pred)))
    sums = pred.reshape(b, cfg['k'], cfg['n_class']).sum(-1)
    assert bool(jnp.all(jnp.abs(sums - 1.0) < 1e-2))   # each row is a softmax
    print("KERNEL_OK")
</pallas_src>

<mosaic_0001>
module attributes {stable_mosaic.version = 11 : i64} {
  func.func @_dps_fused_kernel(%arg0: i32, %arg1: memref<1x108x16xf32, #tpu.memory_space<vmem>>, %arg2: memref<1x64x16xf32, #tpu.memory_space<vmem>>, %arg3: memref<1x16x192xbf16, #tpu.memory_space<vmem>>, %arg4: memref<108x1xf32, #tpu.memory_space<vmem>>, %arg5: memref<192x32xbf16, #tpu.memory_space<vmem>>, %arg6: memref<1x32xf32, #tpu.memory_space<vmem>>, %arg7: memref<32x128xbf16, #tpu.memory_space<vmem>>, %arg8: memref<1x128xf32, #tpu.memory_space<vmem>>, %arg9: memref<1x3x128xf32, #tpu.memory_space<vmem>>) attributes {dimension_semantics = [#tpu.dimension_semantics<parallel>], iteration_bounds = array<i64: 2>, scalar_prefetch = 0 : i64, scratch_operands = 0 : i64, tpu.core_type = #tpu.core_type<tc>, window_params = [{transform_indices = @transform_0, window_bounds = array<i64: 1, 108, 16>}, {transform_indices = @transform_1, window_bounds = array<i64: 1, 64, 16>}, {transform_indices = @transform_2, window_bounds = array<i64: 1, 16, 192>}, {pipeline_mode = #tpu.pipeline_mode<synchronous>, transform_indices = @transform_3, window_bounds = array<i64: 108, 1>}, {pipeline_mode = #tpu.pipeline_mode<synchronous>, transform_indices = @transform_4, window_bounds = array<i64: 192, 32>}, {pipeline_mode = #tpu.pipeline_mode<synchronous>, transform_indices = @transform_5, window_bounds = array<i64: 1, 32>}, {pipeline_mode = #tpu.pipeline_mode<synchronous>, transform_indices = @transform_6, window_bounds = array<i64: 32, 128>}, {pipeline_mode = #tpu.pipeline_mode<synchronous>, transform_indices = @transform_7, window_bounds = array<i64: 1, 128>}, {transform_indices = @transform_8, window_bounds = array<i64: 1, 3, 128>}]} {
    %c0 = arith.constant 0 : index
    %c0_0 = arith.constant 0 : index
    %c0_1 = arith.constant 0 : index
    %0 = vector.load %arg1[%c0, %c0_0, %c0_1] : memref<1x108x16xf32, #tpu.memory_space<vmem>>, vector<1x108x16xf32>
    %1 = vector.shape_cast %0 : vector<1x108x16xf32> to vector<108x16xf32>
    %c0_2 = arith.constant 0 : index
    %c0_3 = arith.constant 0 : index
    %2 = vector.load %arg4[%c0_2, %c0_3] : memref<108x1xf32, #tpu.memory_space<vmem>>, vector<108x1xf32>
    %3 = vector.broadcast %2 : vector<108x1xf32> to vector<108x16xf32>
    %4 = arith.mulf %1, %3 : vector<108x16xf32>
    %5 = vector.extract_strided_slice %4 {offsets = [0, 0], sizes = [27, 16], strides = [1, 1]} : vector<108x16xf32> to vector<27x16xf32>
    %cst = arith.constant dense<0.000000e+00> : vector<16xf32>
    %6 = vector.multi_reduction <add>, %5, %cst [0] : vector<27x16xf32> to vector<16xf32>
    %7 = vector.shape_cast %6 : vector<16xf32> to vector<1x16xf32>
    %8 = vector.extract_strided_slice %4 {offsets = [27, 0], sizes = [27, 16], strides = [1, 1]} : vector<108x16xf32> to vector<27x16xf32>
    %cst_4 = arith.constant dense<0.000000e+00> : vector<16xf32>
    %9 = vector.multi_reduction <add>, %8, %cst_4 [0] : vector<27x16xf32> to vector<16xf32>
    %10 = vector.shape_cast %9 : vector<16xf32> to vector<1x16xf32>
    %11 = vector.extract_strided_slice %4 {offsets = [54, 0], sizes = [27, 16], strides = [1, 1]} : vector<108x16xf32> to vector<27x16xf32>
    %cst_5 = arith.constant dense<0.000000e+00> : vector<16xf32>
    %12 = vector.multi_reduction <add>, %11, %cst_5 [0] : vector<27x16xf32> to vector<16xf32>
    %13 = vector.shape_cast %12 : vector<16xf32> to vector<1x16xf32>
    %14 = vector.extract_strided_slice %4 {offsets = [81, 0], sizes = [27, 16], strides = [1, 1]} : vector<108x16xf32> to vector<27x16xf32>
    %cst_6 = arith.constant dense<0.000000e+00> : vector<16xf32>
    %15 = vector.multi_reduction <add>, %14, %cst_6 [0] : vector<27x16xf32> to vector<16xf32>
    %16 = vector.shape_cast %15 : vector<16xf32> to vector<1x16xf32>
    %17 = arith.maximumf %7, %10 : vector<1x16xf32>
    %18 = arith.maximumf %13, %16 : vector<1x16xf32>
    %19 = arith.maximumf %17, %18 : vector<1x16xf32>
    %cst_7 = arith.constant dense<0x7F800000> : vector<1xf32>
    %20 = vector.multi_reduction <minimumf>, %19, %cst_7 [1] : vector<1x16xf32> to vector<1xf32>
    %21 = vector.shape_cast %20 : vector<1xf32> to vector<1x1xf32>
    %cst_8 = arith.constant dense<0xFF800000> : vector<1xf32>
    %22 = vector.multi_reduction <maximumf>, %19, %cst_8 [1] : vector<1x16xf32> to vector<1xf32>
    %23 = vector.shape_cast %22 : vector<1xf32> to vector<1x1xf32>
    %24 = vector.broadcast %21 : vector<1x1xf32> to vector<1x16xf32>
    %25 = arith.subf %19, %24 : vector<1x16xf32>
    %26 = arith.subf %23, %21 : vector<1x1xf32>
    %cst_9 = arith.constant 9.99999974E-6 : f32
    %27 = vector.broadcast %cst_9 : f32 to vector<1x1xf32>
    %28 = arith.addf %26, %27 : vector<1x1xf32>
    %29 = vector.broadcast %28 : vector<1x1xf32> to vector<1x16xf32>
    %30 = arith.divf %25, %29 : vector<1x16xf32>
    %c0_10 = arith.constant 0 : index
    %c0_11 = arith.constant 0 : index
    %c0_12 = arith.constant 0 : index
    %31 = vector.load %arg2[%c0_10, %c0_11, %c0_12] : memref<1x64x16xf32, #tpu.memory_space<vmem>>, vector<1x64x16xf32>
    %32 = vector.shape_cast %31 : vector<1x64x16xf32> to vector<64x16xf32>
    %cst_13 = arith.constant 5.000000e-02 : f32
    %33 = vector.broadcast %cst_13 : f32 to vector<64x16xf32>
    %34 = arith.mulf %32, %33 : vector<64x16xf32>
    %35 = vector.broadcast %30 : vector<1x16xf32> to vector<64x16xf32>
    %36 = arith.addf %35, %34 : vector<64x16xf32>
    %cst_14 = arith.constant dense<0xFF800000> : vector<64xf32>
    %37 = vector.multi_reduction <maximumf>, %36, %cst_14 [1] : vector<64x16xf32> to vector<64xf32>
    %38 = vector.shape_cast %37 : vector<64xf32> to vector<64x1xf32>
    %39 = vector.broadcast %38 : vector<64x1xf32> to vector<64x16xf32>
    %40 = arith.cmpf oge, %36, %39 : vector<64x16xf32>
    %cst_15 = arith.constant -1.000000e+30 : f32
    %41 = vector.broadcast %cst_15 : f32 to vector<64x16xf32>
    %42 = arith.select %40, %41, %36 : vector<64x16xi1>, vector<64x16xf32>
    %cst_16 = arith.constant dense<0xFF800000> : vector<64xf32>
    %43 = vector.multi_reduction <maximumf>, %42, %cst_16 [1] : vector<64x16xf32> to vector<64xf32>
    %44 = vector.shape_cast %43 : vector<64xf32> to vector<64x1xf32>
    %45 = vector.broadcast %44 : vector<64x1xf32> to vector<64x16xf32>
    %46 = arith.cmpf oge, %42, %45 : vector<64x16xf32>
    %cst_17 = arith.constant -1.000000e+30 : f32
    %47 = vector.broadcast %cst_17 : f32 to vector<64x16xf32>
    %48 = arith.select %46, %47, %42 : vector<64x16xi1>, vector<64x16xf32>
    %cst_18 = arith.constant dense<0xFF800000> : vector<64xf32>
    %49 = vector.multi_reduction <maximumf>, %48, %cst_18 [1] : vector<64x16xf32> to vector<64xf32>
    %50 = vector.shape_cast %49 : vector<64xf32> to vector<64x1xf32>
    %51 = vector.broadcast %50 : vector<64x1xf32> to vector<64x16xf32>
    %52 = arith.cmpf oge, %36, %51 : vector<64x16xf32>
    %53 = arith.extui %52 : vector<64x16xi1> to vector<64x16xi32>
    %54 = arith.sitofp %53 : vector<64x16xi32> to vector<64x16xf32>
    %55 = tpu.iota {dimensions = array<i32: 0>} : vector<16x16xi32>
    %56 = tpu.iota {dimensions = array<i32: 1>} : vector<16x16xi32>
    %57 = arith.cmpi slt, %55, %56 : vector<16x16xi32>
    %58 = arith.extui %57 : vector<16x16xi1> to vector<16x16xi32>
    %59 = arith.sitofp %58 : vector<16x16xi32> to vector<16x16xf32>
    %cst_19 = arith.constant dense<0.000000e+00> : vector<64x16xf32>
    %60 = tpu.matmul %54, %59, %cst_19 {dimension_numbers = #tpu.dot_dimension_numbers<[1], [0], [0], [1], [0, 0, 1, 1], [], []>} : vector<64x16xf32>, vector<16x16xf32>, vector<64x16xf32> -> vector<64x16xf32>
    %cst_20 = arith.constant 0.000000e+00 : f32
    %61 = vector.broadcast %cst_20 : f32 to vector<64x16xf32>
    %62 = arith.subf %60, %61 : vector<64x16xf32>
    %63 = math.absf %62 : vector<64x16xf32>
    %cst_21 = arith.constant 5.000000e-01 : f32
    %64 = vector.broadcast %cst_21 : f32 to vector<64x16xf32>
    %65 = arith.cmpf olt, %63, %64 : vector<64x16xf32>
    %66 = arith.extui %65 : vector<64x16xi1> to vector<64x16xi32>
    %67 = arith.sitofp %66 : vector<64x16xi32> to vector<64x16xf32>
    %68 = arith.mulf %54, %67 : vector<64x16xf32>
    %cst_22 = arith.constant dense<0.000000e+00> : vector<16xf32>
    %69 = vector.multi_reduction <add>, %68, %cst_22 [0] : vector<64x16xf32> to vector<16xf32>
    %70 = vector.shape_cast %69 : vector<16xf32> to vector<1x16xf32>
    %cst_23 = arith.constant 6.400000e+01 : f32
    %71 = vector.broadcast %cst_23 : f32 to vector<1x16xf32>
    %72 = arith.divf %70, %71 : vector<1x16xf32>
    %cst_24 = arith.constant 1.000000e+00 : f32
    %73 = vector.broadcast %cst_24 : f32 to vector<64x16xf32>
    %74 = arith.subf %60, %73 : vector<64x16xf32>
    %75 = math.absf %74 : vector<64x16xf32>
    %cst_25 = arith.constant 5.000000e-01 : f32
    %76 = vector.broadcast %cst_25 : f32 to vector<64x16xf32>
    %77 = arith.cmpf olt, %75, %76 : vector<64x16xf32>
    %78 = arith.extui %77 : vector<64x16xi1> to vector<64x16xi32>
    %79 = arith.sitofp %78 : vector<64x16xi32> to vector<64x16xf32>
    %80 = arith.mulf %54, %79 : vector<64x16xf32>
    %cst_26 = arith.constant dense<0.000000e+00> : vector<16xf32>
    %81 = vector.multi_reduction <add>, %80, %cst_26 [0] : vector<64x16xf32> to vector<16xf32>
    %82 = vector.shape_cast %81 : vector<16xf32> to vector<1x16xf32>
    %cst_27 = arith.constant 6.400000e+01 : f32
    %83 = vector.broadcast %cst_27 : f32 to vector<1x16xf32>
    %84 = arith.divf %82, %83 : vector<1x16xf32>
    %cst_28 = arith.constant 2.000000e+00 : f32
    %85 = vector.broadcast %cst_28 : f32 to vector<64x16xf32>
    %86 = arith.subf %60, %85 : vector<64x16xf32>
    %87 = math.absf %86 : vector<64x16xf32>
    %cst_29 = arith.constant 5.000000e-01 : f32
    %88 = vector.broadcast %cst_29 : f32 to vector<64x16xf32>
    %89 = arith.cmpf olt, %87, %88 : vector<64x16xf32>
    %90 = arith.extui %89 : vector<64x16xi1> to vector<64x16xi32>
    %91 = arith.sitofp %90 : vector<64x16xi32> to vector<64x16xf32>
    %92 = arith.mulf %54, %91 : vector<64x16xf32>
    %cst_30 = arith.constant dense<0.000000e+00> : vector<16xf32>
    %93 = vector.multi_reduction <add>, %92, %cst_30 [0] : vector<64x16xf32> to vector<16xf32>
    %94 = vector.shape_cast %93 : vector<16xf32> to vector<1x16xf32>
    %cst_31 = arith.constant 6.400000e+01 : f32
    %95 = vector.broadcast %cst_31 : f32 to vector<1x16xf32>
    %96 = arith.divf %94, %95 : vector<1x16xf32>
    %97 = tpu.concatenate %72, %84, %96 in 0 : vector<1x16xf32>, vector<1x16xf32>, vector<1x16xf32> -> vector<3x16xf32>
    %c0_32 = arith.constant 0 : index
    %c0_33 = arith.constant 0 : index
    %c0_34 = arith.constant 0 : index
    %98 = vector.load %arg3[%c0_32, %c0_33, %c0_34] : memref<1x16x192xbf16, #tpu.memory_space<vmem>>, vector<1x16x192xbf16>
    %99 = vector.shape_cast %98 : vector<1x16x192xbf16> to vector<16x192xbf16>
    %100 = arith.truncf %97 : vector<3x16xf32> to vector<3x16xbf16>
    %cst_35 = arith.constant dense<0.000000e+00> : vector<3x192xf32>
    %101 = tpu.matmul %100, %99, %cst_35 {dimension_numbers = #tpu.dot_dimension_numbers<[1], [0], [0], [1], [0, 0, 1, 1], [], []>} : vector<3x16xbf16>, vector<16x192xbf16>, vector<3x192xf32> -> vector<3x192xf32>
    %102 = arith.truncf %101 : vector<3x192xf32> to vector<3x192xbf16>
    %c0_36 = arith.constant 0 : index
    %c0_37 = arith.constant 0 : index
    %103 = vector.load %arg5[%c0_36, %c0_37] : memref<192x32xbf16, #tpu.memory_space<vmem>>, vector<192x32xbf16>
    %cst_38 = arith.constant dense<0.000000e+00> : vector<3x32xf32>
    %104 = tpu.matmul %102, %103, %cst_38 {dimension_numbers = #tpu.dot_dimension_numbers<[1], [0], [0], [1], [0, 0, 1, 1], [], []>} : vector<3x192xbf16>, vector<192x32xbf16>, vector<3x32xf32> -> vector<3x32xf32>
    %c0_39 = arith.constant 0 : index
    %c0_40 = arith.constant 0 : index
    %105 = vector.load %arg6[%c0_39, %c0_40] : memref<1x32xf32, #tpu.memory_space<vmem>>, vector<1x32xf32>
    %106 = vector.broadcast %105 : vector<1x32xf32> to vector<3x32xf32>
    %107 = arith.addf %104, %106 : vector<3x32xf32>
    %108 = arith.truncf %107 : vector<3x32xf32> to vector<3x32xbf16>
    %c0_41 = arith.constant 0 : index
    %c0_42 = arith.constant 0 : index
    %109 = vector.load %arg7[%c0_41, %c0_42] : memref<32x128xbf16, #tpu.memory_space<vmem>>, vector<32x128xbf16>
    %cst_43 = arith.constant dense<0.000000e+00> : vector<3x128xf32>
    %110 = tpu.matmul %108, %109, %cst_43 {dimension_numbers = #tpu.dot_dimension_numbers<[1], [0], [0], [1], [0, 0, 1, 1], [], []>} : vector<3x32xbf16>, vector<32x128xbf16>, vector<3x128xf32> -> vector<3x128xf32>
    %c0_44 = arith.constant 0 : index
    %c0_45 = arith.constant 0 : index
    %111 = vector.load %arg8[%c0_44, %c0_45] : memref<1x128xf32, #tpu.memory_space<vmem>>, vector<1x128xf32>
    %112 = vector.broadcast %111 : vector<1x128xf32> to vector<3x128xf32>
    %113 = arith.addf %110, %112 : vector<3x128xf32>
    %cst_46 = arith.constant dense<0xFF800000> : vector<3xf32>
    %114 = vector.multi_reduction <maximumf>, %113, %cst_46 [1] : vector<3x128xf32> to vector<3xf32>
    %115 = vector.shape_cast %114 : vector<3xf32> to vector<3x1xf32>
    %116 = vector.broadcast %115 : vector<3x1xf32> to vector<3x128xf32>
    %117 = arith.subf %113, %116 : vector<3x128xf32>
    %118 = math.exp %117 : vector<3x128xf32>
    %cst_47 = arith.constant dense<0.000000e+00> : vector<3xf32>
    %119 = vector.multi_reduction <add>, %118, %cst_47 [1] : vector<3x128xf32> to vector<3xf32>
    %120 = vector.shape_cast %119 : vector<3xf32> to vector<3x1xf32>
    %121 = vector.broadcast %120 : vector<3x1xf32> to vector<3x128xf32>
    %122 = arith.divf %118, %121 : vector<3x128xf32>
    %c0_48 = arith.constant 0 : index
    %c0_49 = arith.constant 0 : index
    %c0_50 = arith.constant 0 : index
    %123 = vector.load %arg9[%c0_48, %c0_49, %c0_50] : memref<1x3x128xf32, #tpu.memory_space<vmem>>, vector<1x3x128xf32>
    %124 = vector.shape_cast %123 : vector<1x3x128xf32> to vector<3x128xf32>
    %125 = vector.shape_cast %122 : vector<3x128xf32> to vector<1x3x128xf32>
    tpu.vector_store %arg9[%c0_48, %c0_49, %c0_50], %125 {strides = array<i32>} : memref<1x3x128xf32, #tpu.memory_space<vmem>>, vector<1x3x128xf32>,
    return
  }
  func.func @transform_0(%arg0: i32) -> (i32, i32, i32) {
    %c0_i32 = arith.constant 0 : i32
    %c0_i32_0 = arith.constant 0 : i32
    %c0_i32_1 = arith.constant 0 : i32
    return %arg0, %c0_i32, %c0_i32_0 : i32, i32, i32
  }
  func.func @transform_1(%arg0: i32) -> (i32, i32, i32) {
    %c0_i32 = arith.constant 0 : i32
    %c0_i32_0 = arith.constant 0 : i32
    %c0_i32_1 = arith.constant 0 : i32
    return %arg0, %c0_i32, %c0_i32_0 : i32, i32, i32
  }
  func.func @transform_2(%arg0: i32) -> (i32, i32, i32) {
    %c0_i32 = arith.constant 0 : i32
    %c0_i32_0 = arith.constant 0 : i32
    %c0_i32_1 = arith.constant 0 : i32
    return %arg0, %c0_i32, %c0_i32_0 : i32, i32, i32
  }
  func.func @transform_3(%arg0: i32) -> (i32, i32) {
    %c0_i32 = arith.constant 0 : i32
    %c0_i32_0 = arith.constant 0 : i32
    %c0_i32_1 = arith.constant 0 : i32
    return %c0_i32, %c0_i32_0 : i32, i32
  }
  func.func @transform_4(%arg0: i32) -> (i32, i32) {
    %c0_i32 = arith.constant 0 : i32
    %c0_i32_0 = arith.constant 0 : i32
    %c0_i32_1 = arith.constant 0 : i32
    return %c0_i32, %c0_i32_0 : i32, i32
  }
  func.func @transform_5(%arg0: i32) -> (i32, i32) {
    %c0_i32 = arith.constant 0 : i32
    %c0_i32_0 = arith.constant 0 : i32
    %c0_i32_1 = arith.constant 0 : i32
    return %c0_i32, %c0_i32_0 : i32, i32
  }
  func.func @transform_6(%arg0: i32) -> (i32, i32) {
    %c0_i32 = arith.constant 0 : i32
    %c0_i32_0 = arith.constant 0 : i32
    %c0_i32_1 = arith.constant 0 : i32
    return %c0_i32, %c0_i32_0 : i32, i32
  }
  func.func @transform_7(%arg0: i32) -> (i32, i32) {
    %c0_i32 = arith.constant 0 : i32
    %c0_i32_0 = arith.constant 0 : i32
    %c0_i32_1 = arith.constant 0 : i32
    return %c0_i32, %c0_i32_0 : i32, i32
  }
  func.func @transform_8(%arg0: i32) -> (i32, i32, i32) {
    %c0_i32 = arith.constant 0 : i32
    %c0_i32_0 = arith.constant 0 : i32
    %c0_i32_1 = arith.constant 0 : i32
    return %arg0, %c0_i32, %c0_i32_0 : i32, i32, i32
  }
}

</mosaic_0001>

<bundles_post_ra>
// kernel: tpu_custom_call.1
= control target key start
LH: loop header
LB: loop body
LE: loop exit
PB: predicated region body
PF: predicated region fallthrough
CT: control target
= control target key end

     0   :  { %s1668_s27 = smov 0   ;;  %s2063_s0 = inlined_call_operand.vmem [shape: f32[2,108,16], index: 0, kind: input, shape index: {}]   ;;  %s2064_s1 = inlined_call_operand.vmem [shape: f32[2,64,16], index: 1, kind: input, shape index: {}]   ;;  %s2065_s2 = inlined_call_operand.vmem [shape: bf16[2,16,192], index: 2, kind: input, shape index: {}]   ;;  %s2066_s3 = inlined_call_operand.vmem [shape: f32[108,1], index: 3, kind: input, shape index: {}]   ;;  %s2067_s4 = inlined_call_operand.vmem [shape: bf16[192,32], index: 4, kind: input, shape index: {}]   ;;  %s2068_s5 = inlined_call_operand.vmem [shape: f32[1,32], index: 5, kind: input, shape index: {}]   ;;  %s2069_s6 = inlined_call_operand.vmem [shape: bf16[32,128], index: 6, kind: input, shape index: {}]   ;;  %s2070_s7 = inlined_call_operand.vmem [shape: f32[1,128], index: 7, kind: input, shape index: {}]   ;;  %s2071_s8 = inlined_call_operand.vmem [shape: f32[2,3,128], index: 8, kind: output, shape index: {}]  }
   0x1 LB: > { %s1436_s28 = sadd.s32 4294967295, %s1617_s27   ;;  %p1440_p0 = scmp.ge.s32.totalorder %s1617_s27, 1  ;;  %s1617_s27 = sphi %s1668_s27, %s18_s27  }
   0x2   : > { %p282_p1 = scmp.lt.s32.totalorder %s1617_s27, 3 }
   0x4   : > { %p283_p2 = pnand %p1440_p0, %p282_p1 }
   0x5   : > { %v364_v0 = vld [vmem:[%s2066_s3 + $0x28] sm:$0xff] (!%p283_p2)  ;;  %v362_v1 = vld [vmem:[%s2066_s3 + $0x18] sm:$0xff] (!%p283_p2)  ;;  %v1619_v2 = vmov (!%p283_p2), 0   ;;  %v365_v3 = vld [vmem:[%s2066_s3 + $0x30] sm:$0xff] (!%p283_p2)  ;;  %p325_p3 = scmp.lt.s32.totalorder (!%p283_p2), %s1436_s28, 1  ;;  %vm476_vm0 = vcmask (!%p283_p2), 1044480  }
   0x6   : > { %286 = sbr.rel (%p283_p2) target bundleno = 2021 (0x7e5), region = 52  ;;  %1587 = vset.pattern.permute.xlu1 (!%p283_p2), %v1619_v2  ;;  %1586 = vset.pattern.permute.xlu0 (!%p283_p2), %v1619_v2  ;;  %v363_v4 = vld [vmem:[%s2066_s3 + $0x20] sm:$0xff] (!%p283_p2)  ;;  %v366_v6 = vld [vmem:[%s2066_s3 + $0x38] sm:$0xff] (!%p283_p2)  ;;  %v369_v8 = vld [vmem:[%s2066_s3 + $0x50] sm:$0xff] (!%p283_p2)  ;;  %vm457_vm1 = vcmask (!%p283_p2), 130048   ;;  %vm505_vm2 = vcmask (!%p283_p2), 1041408  }
   0x7   : > { %400 = vperm.xlu1 (!%p283_p2), %1587, %v364_v0   ;;  %390 = vperm.xlu0 (!%p283_p2), %1586, %v362_v1   ;;  %v367_v5 = vld [vmem:[%s2066_s3 + $0x40] sm:$0xff] (!%p283_p2)  ;;  %v370_v7 = vld [vmem:[%s2066_s3 + $0x58] sm:$0xff] (!%p283_p2)  ;;  %v368_v9 = vld [vmem:[%s2066_s3 + $0x48] sm:$0xff] (!%p283_p2)  ;;  %vm535_vm3 = vcmask (!%p283_p2), 1046528   ;;  %vm463_vm4 = vcmask (!%p283_p2), 124928  }
   0x8   : > { %1238 = vmatprep.subr.bf16.mxu0 (!%p283_p2), %v1619_v2  ;;  %v371_v10 = vld [vmem:[%s2066_s3 + $0x60] sm:$0xff] (!%p283_p2)  ;;  %v372_v11 = vld [vmem:[%s2066_s3 + $0x68] sm:$0xf] (!%p283_p2)  ;;  %v361_v14 = vld [vmem:[%s2066_s3 + $0x10] sm:$0xff] (!%p283_p2) }
   0x9   : > { %v359_v12 = vld [vmem:[%s2066_s3] sm:$0xff] (!%p283_p2)  ;;  %v360_v13 = vld [vmem:[%s2066_s3 + $0x8] sm:$0xff] (!%p283_p2) }
   0xb   : > { %405 = vperm.xlu1 (!%p283_p2), %1587, %v365_v3   ;;  %395 = vperm.xlu0 (!%p283_p2), %1586, %v363_v4  }
   0xd   : > { %s2073_s28 = smov (!%p325_p3, %s1436_s28), 1 }
   0xe   : > { %s1573_s15 = smul.u32 112, %s2073_s28  ;;  %s1530_s19 = sshll.u32 %s2073_s28, 6 }
   0xf   : > { %415 = vperm.xlu1 %1587, %v367_v5   ;;  %410 = vperm.xlu0 %1586, %v366_v6   ;;  %s1783_s22 = scalar_lea.vmem %s2064_s1, %s1530_s19  ;;  %s1531_s23 = sshll.u32 %s2073_s28, 4 }
  0x10   : > { %s1731_s18 = scalar_lea.vmem %s2063_s0, %s1573_s15  ;;  %s339_s26 = scalar_lea.vmem %s2065_s2, %s1531_s23 }
  0x11   : > { %v350_v16 = vld [vmem:[%s1731_s18 + $0x28] sm:$0xff]  ;;  %v348_v18 = vld [vmem:[%s1731_s18 + $0x18] sm:$0xff]  ;;  %v351_v19 = vld [vmem:[%s1731_s18 + $0x30] sm:$0xff]  ;;  %s1446_s19 = sshll.u32 %s2073_s28, 2 }
  0x12   : > { %v349_v20 = vld [vmem:[%s1731_s18 + $0x20] sm:$0xff]  ;;  %v352_v34 = vld [vmem:[%s1731_s18 + $0x38] sm:$0xff]  ;;  %v355_v41 = vld [vmem:[%s1731_s18 + $0x50] sm:$0xff] }
  0x13   : > { %430 = vperm.xlu1 %1587, %v370_v7   ;;  %425 = vperm.xlu0 %1586, %v369_v8   ;;  %v353_v30 = vld [vmem:[%s1731_s18 + $0x40] sm:$0xff]  ;;  %v356_v40 = vld [vmem:[%s1731_s18 + $0x58] sm:$0xff]  ;;  %v354_v52 = vld [vmem:[%s1731_s18 + $0x48] sm:$0xff] }
  0x14   : > { %v357_v53 = vld [vmem:[%s1731_s18 + $0x60] sm:$0xff]  ;;  %v358_v3 = vld [vmem:[%s1731_s18 + $0x68] sm:$0xf] }
  0x17   : > { %420 = vperm.xlu1 %1587, %v368_v9   ;;  %435 = vperm.xlu0 %1586, %v371_v10  }
  0x1b   : > { %440 = vperm.xlu0 %1586, %v372_v11   ;;  %375 = vperm.xlu1 %1587, %v359_v12  }
  0x1f   : > { %380 = vperm.xlu0 %1586, %v360_v13   ;;  %385 = vperm.xlu1 %1587, %v361_v14   ;;  %v345_v13 = vld [vmem:[%s1731_s18] sm:$0xff] }
  0x86   : > { %v401_v15 = vpop.permute.xlu1 %400  ;;  %v391_v17 = vpop.permute.xlu0 %390 }
  0x87   : > { %v448_v21 = vmul.f32 %v401_v15, %v350_v16  ;;  %v1737_v22 = vmul.f32 %v391_v17, %v348_v18 }
  0x89   : > { %v480_v27 = vrot.slane %v448_v21, 3  ;;  %v477_v28 = vrot.slane %v1737_v22, 3 }
  0x8a   : > { %v406_v23 = vpop.permute.xlu1 %405  ;;  %v396_v24 = vpop.permute.xlu0 %395 }
  0x8b   : > { %v449_v25 = vmul.f32 %v406_v23, %v351_v19  ;;  %v447_v26 = vmul.f32 %v396_v24, %v349_v20  ;;  %v346_v20 = vld [vmem:[%s1731_s18 + $0x8] sm:$0xff] }
  0x8d   : > { %v478_v29 = vrot.slane %v447_v26, 3  ;;  %v482_v31 = vrot.slane %v449_v25, 3  ;;  %v506_v48 = vrot.slane %v449_v25, 6  ;;  %v347_v25 = vld [vmem:[%s1731_s18 + $0x10] sm:$0xff] }
  0x8e   : > { %v416_v32 = vpop.permute.xlu1 %415  ;;  %v411_v33 = vpop.permute.xlu0 %410 }
  0x8f   : > { %v479_v35 = vsel %vm476_vm0, %v477_v28, %v478_v29  ;;  %v481_v36 = vsel %vm476_vm0, %v478_v29, %v480_v27  ;;  %v451_v39 = vmul.f32 %v416_v32, %v353_v30  ;;  %v450_v42 = vmul.f32 %v411_v33, %v352_v34 }
  0x90   : > { %v488_v37 = vsel %vm457_vm1, %v479_v35, 0.0  ;;  %v489_v38 = vsel %vm457_vm1, %v481_v36, 0.0  ;;  %v483_v43 = vsel %vm476_vm0, %v480_v27, %v482_v31  ;;  %v493_v4 = vsel %vm463_vm4, %v482_v31, 0.0 }
  0x91   : > { %v490_v44 = vadd.f32 %v489_v38, %v488_v37  ;;  %v509_v45 = vrot.slane %v451_v39, 6  ;;  %v507_v49 = vrot.slane %v450_v42, 6  ;;  %v491_v54 = vsel %vm457_vm1, %v483_v43, 0.0 }
  0x92   : > { %v431_v46 = vpop.permute.xlu1 %430  ;;  %v426_v47 = vpop.permute.xlu0 %425 }
  0x93   : > { %v454_v50 = vmul.f32 %v431_v46, %v356_v40  ;;  %v453_v51 = vmul.f32 %v426_v47, %v355_v41  ;;  %v508_v55 = vsel %vm505_vm2, %v506_v48, %v507_v49  ;;  %v510_v56 = vsel %vm505_vm2, %v507_v49, %v509_v45 }
  0x94   : > { %v492_v57 = vadd.f32 %v491_v54, %v490_v44  ;;  %v519_v62 = vsel %vm457_vm1, %v508_v55, 0.0  ;;  %v520_v63 = vsel %vm457_vm1, %v510_v56, 0.0  ;;  %v464_v48 = vsel %vm463_vm4, %v1737_v22, 0.0 }
  0x95   : > { %v537_v58 = vrot.slane %v454_v50, 1  ;;  %v536_v59 = vrot.slane %v453_v51, 1  ;;  %v513_v5 = vrot.slane %v453_v51, 6  ;;  %v521_v9 = vadd.f32 %v520_v63, %v519_v62 }
  0x96   : > { %v421_v60 = vpop.permute.xlu1 %420  ;;  %v436_v61 = vpop.permute.xlu0 %435  ;;  %v494_v8 = vadd.f32 %v493_v4, %v492_v57 }
  0x97   : > { %v452_v0 = vmul.f32 %v421_v60, %v354_v52  ;;  %v455_v1 = vmul.f32 %v436_v61, %v357_v53  ;;  %v538_v10 = vsel %vm535_vm3, %v536_v59, %v537_v58 }
  0x98   : > { %v495_v26 = vrot.slane %v494_v8, 4  ;;  %v547_v27 = vsel %vm457_vm1, %v538_v10, 0.0 }
  0x99   : > { %v511_v6 = vrot.slane %v452_v0, 6  ;;  %v539_v7 = vrot.slane %v455_v1, 1 }
  0x9a   : > { %v441_v11 = vpop.permute.xlu0 %440  ;;  %v376_v12 = vpop.permute.xlu1 %375  ;;  %v496_v43 = vadd.f32 %v495_v26, %v494_v8 }
  0x9b   : > { %v512_v14 = vsel %vm505_vm2, %v509_v45, %v511_v6  ;;  %v514_v15 = vsel %vm505_vm2, %v511_v6, %v513_v5  ;;  %v540_v16 = vsel %vm535_vm3, %v537_v58, %v539_v7  ;;  %v456_v17 = vmul.f32 %v441_v11, %v358_v3 }
  0x9c   : > { %v522_v18 = vsel %vm457_vm1, %v512_v14, 0.0  ;;  %v548_v19 = vsel %vm457_vm1, %v540_v16, 0.0  ;;  %v443_v24 = vmul.f32 %v376_v12, %v345_v13  ;;  %v524_v28 = vsel %vm463_vm4, %v514_v15, 0.0  ;;  %v576_v15 = vld [vmem:[%s1783_s22 + $0x10] sm:$0xff]  ;;  %v574_v16 = vld [vmem:[%s1783_s22] sm:$0xff] }
  0x9d   : > { %v523_v21 = vadd.f32 %v522_v18, %v521_v9  ;;  %v541_v23 = vrot.slane %v456_v17, 1  ;;  %v549_v32 = vadd.f32 %v548_v19, %v547_v27  ;;  %v497_v52 = vrot.slane %v496_v43, 2  ;;  %v578_v17 = vld [vmem:[%s1783_s22 + $0x20] sm:$0xff]  ;;  %v575_v18 = vld [vmem:[%s1783_s22 + $0x8] sm:$0xff]  ;;  %v580_v27 = vld [vmem:[%s1783_s22 + $0x30] sm:$0xff] }
  0x9e   : > { %v381_v29 = vpop.permute.xlu0 %380  ;;  %v386_v30 = vpop.permute.xlu1 %385  ;;  %v458_v39 = vsel %vm457_vm1, %v443_v24, 0.0  ;;  %v583_v26 = vmul.f32 0.05, %v575_v18 }
  0x9f   : > { %v525_v31 = vadd.f32 %v524_v28, %v523_v21  ;;  %v542_v33 = vsel %vm535_vm3, %v539_v7, %v541_v23  ;;  %v444_v34 = vmul.f32 %v381_v29, %v346_v20  ;;  %v445_v36 = vmul.f32 %v386_v30, %v347_v25  ;;  %v577_v28 = vld [vmem:[%s1783_s22 + $0x18] sm:$0xff] }
  0xa0   : > { %v550_v35 = vsel %vm457_vm1, %v542_v33, 0.0  ;;  %v552_v41 = vsel %vm463_vm4, %v541_v23, 0.0  ;;  %v498_v57 = vadd.f32 %v497_v52, %v496_v43  ;;  %v584_v20 = vmul.f32 0.05, %v576_v15  ;;  %v581_v43 = vld [vmem:[%s1783_s22 + $0x38] sm:$0xff] }
  0xa1   : > { %v526_v37 = vrot.slane %v525_v31, 4  ;;  %v551_v38 = vadd.f32 %v550_v35, %v549_v32  ;;  %v459_v40 = vsel %vm457_vm1, %v444_v34, 0.0  ;;  %v461_v46 = vsel %vm457_vm1, %v445_v36, 0.0 }
  0xa2   : > { %v460_v42 = vadd.f32 %v459_v40, %v458_v39  ;;  %v499_v63 = vrot.slane %v498_v57, 1  ;;  %v582_v21 = vmul.f32 0.05, %v574_v16  ;;  %v586_v25 = vmul.f32 0.05, %v578_v17 }
  0xa3   : > { %v527_v44 = vadd.f32 %v526_v37, %v525_v31  ;;  %v553_v45 = vadd.f32 %v552_v41, %v551_v38  ;;  %v588_v31 = vmul.f32 0.05, %v580_v27  ;;  %v585_v32 = vmul.f32 0.05, %v577_v28  ;;  %v579_v37 = vld [vmem:[%s1783_s22 + $0x28] sm:$0xff]  ;;  %s343_s22 = scalar_lea.vmem %s2071_s8, %s1446_s19 }
  0xa4   : > { %v462_v47 = vadd.f32 %v461_v46, %v460_v42  ;;  %v500_v4 = vadd.f32 %v499_v63, %v498_v57  ;;  %v587_v38 = vmul.f32 0.05, %v579_v37  ;;  %v726_v37 = vlaneseq }
  0xa5   : > { %v554_v49 = vrot.slane %v553_v45, 4  ;;  %v528_v50 = vrot.slane %v527_v44, 2 }
  0xa6   : > { %v465_v51 = vadd.f32 %v464_v48, %v462_v47  ;;  %v589_v47 = vmul.f32 0.05, %v581_v43 }
  0xa7   : > { %v555_v53 = vadd.f32 %v554_v49, %v553_v45  ;;  %v529_v58 = vadd.f32 %v528_v50, %v527_v44 }
  0xa8   : > { %v466_v54 = vrot.slane %v465_v51, 4 }
  0xa9   : > { %v556_v55 = vrot.slane %v555_v53, 2  ;;  %v530_v0 = vrot.slane %v529_v58, 1 }
  0xaa   : > { %v467_v56 = vadd.f32 %v466_v54, %v465_v51 }
  0xab   : > { %v557_v59 = vadd.f32 %v556_v55, %v555_v53  ;;  %v531_v5 = vadd.f32 %v530_v0, %v529_v58 }
  0xac   : > { %v468_v60 = vrot.slane %v467_v56, 2 }
  0xad   : > { %v558_v61 = vrot.slane %v557_v59, 1 }
  0xae   : > { %v469_v62 = vadd.f32 %v468_v60, %v467_v56 }
  0xaf   : > { %v559_v3 = vadd.f32 %v558_v61, %v557_v59 }
  0xb0   : > { %v470_v1 = vrot.slane %v469_v62, 1 }
  0xb1   : > { %v561_v7 = vmax.f32 %v531_v5, %v559_v3 }
  0xb2   : > { %v471_v22 = vadd.f32 %v470_v1, %v469_v62 }
  0xb4   : > { %v560_v6 = vmax.f32 %v471_v22, %v500_v4 }
  0xb6   : > { %v562_v8 = vmax.f32 %v560_v6, %v561_v7 }
  0xb8   : > { %v566_v9 = vsel %vm457_vm1, %v562_v8, -inf  ;;  %v563_v10 = vsel %vm457_vm1, %v562_v8, inf }
  0xb9   : > { %567 = vmax.xlane.f32.xlu1 %v566_v9  ;;  %564 = vmin.xlane.f32.xlu0 %v563_v10 }
 0x146   : > { %v568_v11 = vpop.xlane.xlu1 %567  ;;  %v565_v12 = vpop.xlane.xlu0 %564 }
 0x147   : > { %v570_v13 = vsub.f32 %v568_v11, %v565_v12  ;;  %v569_v19 = vsub.f32 %v562_v8, %v565_v12 }
 0x149   : > { %v571_v14 = vadd.f32 1e-05, %v570_v13 }
 0x14b   : > { %1605 = vrcp.f32 %v571_v14 }
 0x155   : > { %v1606_v23 = vpop.eup %1605 }
 0x156   : > { %v573_v24 = vmul.f32 %v1606_v23, %v569_v19 }
 0x158   : > { %v1791_v29 = vadd.f32 %v584_v20, %v573_v24  ;;  %v1793_v30 = vadd.f32 %v582_v21, %v573_v24  ;;  %v1799_v35 = vadd.f32 %v586_v25, %v573_v24  ;;  %v1801_v36 = vadd.f32 %v583_v26, %v573_v24 }
 0x159   : > { %v1808_v41 = vadd.f32 %v588_v31, %v573_v24  ;;  %v1810_v42 = vadd.f32 %v585_v32, %v573_v24  ;;  %v1817_v46 = vadd.f32 %v587_v38, %v573_v24  ;;  %v1821_v49 = vadd.f32 %v589_v47, %v573_v24 }
 0x15a   : > { %v604_v33 = vsel %vm457_vm1, %v1791_v29, -inf  ;;  %v598_v34 = vsel %vm457_vm1, %v1793_v30, -inf  ;;  %v610_v39 = vsel %vm457_vm1, %v1799_v35, -inf  ;;  %v601_v40 = vsel %vm457_vm1, %v1801_v36, -inf }
 0x15b   : > { %605 = vmax.xlane.f32.xlu1 %v604_v33  ;;  %599 = vmax.xlane.f32.xlu0 %v598_v34  ;;  %v616_v44 = vsel %vm457_vm1, %v1808_v41, -inf  ;;  %v607_v45 = vsel %vm457_vm1, %v1810_v42, -inf  ;;  %v613_v48 = vsel %vm457_vm1, %v1817_v46, -inf  ;;  %v619_v50 = vsel %vm457_vm1, %v1821_v49, -inf }
 0x15c   : > { %v1620_v47 = vmov 1.0|1.0  }
 0x15f   : > { %611 = vmax.xlane.f32.xlu1 %v610_v39  ;;  %602 = vmax.xlane.f32.xlu0 %v601_v40  ;;  %v727_v39 = vshrl.u32 %v726_v37, 7 }
 0x163   : > { %617 = vmax.xlane.f32.xlu1 %v616_v44  ;;  %608 = vmax.xlane.f32.xlu0 %v607_v45  ;;  %v728_v44 = vadd.s32 8, %v727_v39  ;;  %v730_v45 = vand.u32 127, %v726_v37 }
 0x167   : > { %614 = vmax.xlane.f32.xlu0 %v613_v48 }
 0x16b   : > { %620 = vmax.xlane.f32.xlu0 %v619_v50  ;;  %v1621_v50 = vmov 0.0  }
 0x1e8   : > { %v606_v51 = vpop.xlane.xlu1 %605  ;;  %v600_v52 = vpop.xlane.xlu0 %599 }
 0x1e9   : > { %vm624_vm5 = vcmp.ge.f32.partialorder %v1791_v29, %v606_v51  ;;  %vm622_vm6 = vcmp.ge.f32.partialorder %v1793_v30, %v600_v52 }
 0x1ea   : > { %v630_v53 = vsel %vm622_vm6, -1e+30, %v1793_v30  ;;  %v632_v55 = vsel %vm624_vm5, -1e+30, %v1791_v29 }
 0x1eb   : > { %v638_v54 = vsel %vm457_vm1, %v630_v53, -inf  ;;  %v644_v59 = vsel %vm457_vm1, %v632_v55, -inf }
 0x1ec   : > { %v612_v56 = vpop.xlane.xlu1 %611  ;;  %639 = vmax.xlane.f32.xlu1 %v638_v54  ;;  %v603_v57 = vpop.xlane.xlu0 %602 }
 0x1ed   : > { %vm626_vm7 = vcmp.ge.f32.partialorder %v1799_v35, %v612_v56  ;;  %vm623_vm8 = vcmp.ge.f32.partialorder %v1801_v36, %v603_v57 }
 0x1ee   : > { %v631_v58 = vsel %vm623_vm8, -1e+30, %v1801_v36  ;;  %v634_v61 = vsel %vm626_vm7, -1e+30, %v1799_v35  ;;  %vm731_vm7 = vcmp.lt.s32.totalorder %v727_v39, %v730_v45  ;;  %vm732_vm8 = vcmp.lt.s32.totalorder %v728_v44, %v730_v45 }
 0x1ef   : > { %v641_v60 = vsel %vm457_vm1, %v631_v58, -inf  ;;  %v650_v1 = vsel %vm457_vm1, %v634_v61, -inf }
 0x1f0   : > { %v618_v62 = vpop.xlane.xlu1 %617  ;;  %645 = vmax.xlane.f32.xlu1 %v644_v59  ;;  %642 = vmax.xlane.f32.xlu0 %v641_v60  ;;  %v609_v63 = vpop.xlane.xlu0 %608 }
 0x1f1   : > { %vm628_vm9 = vcmp.ge.f32.partialorder %v1808_v41, %v618_v62  ;;  %vm625_vm10 = vcmp.ge.f32.partialorder %v1810_v42, %v609_v63  ;;  %v1593_v62 = vld [vmem:[%s2067_s4 + $0x10] sm:$0xff]   ;;  %v1594_v63 = vld [vmem:[%s2067_s4 + $0x18] sm:$0xff]  }
 0x1f2   : > { %v633_v0 = vsel %vm625_vm10, -1e+30, %v1810_v42  ;;  %v636_v22 = vsel %vm628_vm9, -1e+30, %v1808_v41  ;;  %vm1569_vm9 = vmpackc.low %vm732_vm8, %vm731_vm7 }
 0x1f3   : > { %v647_v3 = vsel %vm457_vm1, %v633_v0, -inf  ;;  %v656_v6 = vsel %vm457_vm1, %v636_v22, -inf  ;;  %1570 = vmatprep.subr.msk.bf16.mxu1 %vm1569_vm9, %v1620_v47 }
 0x1f4   : > { %651 = vmax.xlane.f32.xlu1 %v650_v1  ;;  %648 = vmax.xlane.f32.xlu0 %v647_v3  ;;  %v615_v4 = vpop.xlane.xlu0 %614  ;;  %v1596_v1 = vld [vmem:[%s2067_s4 + $0x28] sm:$0xff]   ;;  %v1597_v3 = vld [vmem:[%s2067_s4 + $0x30] sm:$0xff]  }
 0x1f5   : > { %vm627_vm11 = vcmp.ge.f32.partialorder %v1817_v46, %v615_v4  ;;  %1572 = vmatpush3.bf16.msk.msra.mxu1 %vm1569_vm9, %v1620_v47  ;;  %v1599_v4 = vld [vmem:[%s2067_s4 + $0x40] sm:$0xff]  }
 0x1f6   : > { %v635_v5 = vsel %vm627_vm11, -1e+30, %v1817_v46 }
 0x1f7   : > { %v653_v7 = vsel %vm457_vm1, %v635_v5, -inf }
 0x1f8   : > { %657 = vmax.xlane.f32.xlu1 %v656_v6  ;;  %654 = vmax.xlane.f32.xlu0 %v653_v7  ;;  %v621_v8 = vpop.xlane.xlu0 %620  ;;  %v1601_v6 = vld [vmem:[%s2067_s4 + $0x50] sm:$0xff]  }
 0x1f9   : > { %vm629_vm12 = vcmp.ge.f32.partialorder %v1821_v49, %v621_v8 }
 0x1fa   : > { %v637_v9 = vsel %vm629_vm12, -1e+30, %v1821_v49 }
 0x1fb   : > { %v659_v10 = vsel %vm457_vm1, %v637_v9, -inf }
 0x1fc   : > { %660 = vmax.xlane.f32.xlu0 %v659_v10 }
 0x279   : > { %v640_v11 = vpop.xlane.xlu1 %639 }
 0x27a   : > { %vm662_vm13 = vcmp.ge.f32.partialorder %v630_v53, %v640_v11 }
 0x27b   : > { %v670_v12 = vsel %vm662_vm13, -1e+30, %v630_v53 }
 0x27c   : > { %v678_v13 = vsel %vm457_vm1, %v670_v12, -inf }
 0x27d   : > { %679 = vmax.xlane.f32.xlu1 %v678_v13  ;;  %v646_v14 = vpop.xlane.xlu1 %645  ;;  %v643_v15 = vpop.xlane.xlu0 %642 }
 0x27e   : > { %vm664_vm14 = vcmp.ge.f32.partialorder %v632_v55, %v646_v14  ;;  %vm663_vm15 = vcmp.ge.f32.partialorder %v631_v58, %v643_v15 }
 0x27f   : > { %v672_v16 = vsel %vm664_vm14, -1e+30, %v632_v55  ;;  %v671_v17 = vsel %vm663_vm15, -1e+30, %v631_v58 }
 0x280   : > { %v684_v18 = vsel %vm457_vm1, %v672_v16, -inf  ;;  %v681_v19 = vsel %vm457_vm1, %v671_v17, -inf }
 0x281   : > { %685 = vmax.xlane.f32.xlu1 %v684_v18  ;;  %v652_v20 = vpop.xlane.xlu1 %651  ;;  %682 = vmax.xlane.f32.xlu0 %v681_v19  ;;  %v649_v21 = vpop.xlane.xlu0 %648 }
 0x282   : > { %vm666_vm0 = vcmp.ge.f32.partialorder %v634_v61, %v652_v20  ;;  %vm665_vm3 = vcmp.ge.f32.partialorder %v633_v0, %v649_v21 }
 0x283   : > { %v674_v23 = vsel %vm666_vm0, -1e+30, %v634_v61  ;;  %v673_v24 = vsel %vm665_vm3, -1e+30, %v633_v0  ;;  %v1592_v61 = vld [vmem:[%s2067_s4 + $0x8] sm:$0xff]   ;;  %v1595_v0 = vld [vmem:[%s2067_s4 + $0x20] sm:$0xff]  }
 0x284   : > { %v690_v25 = vsel %vm457_vm1, %v674_v23, -inf  ;;  %v687_v26 = vsel %vm457_vm1, %v673_v24, -inf }
 0x285   : > { %691 = vmax.xlane.f32.xlu1 %v690_v25  ;;  %v658_v27 = vpop.xlane.xlu1 %657  ;;  %688 = vmax.xlane.f32.xlu0 %v687_v26  ;;  %v655_v28 = vpop.xlane.xlu0 %654 }
 0x286   : > { %vm668_vm4 = vcmp.ge.f32.partialorder %v636_v22, %v658_v27  ;;  %vm667_vm5 = vcmp.ge.f32.partialorder %v635_v5, %v655_v28 }
 0x287   : > { %v676_v31 = vsel %vm668_vm4, -1e+30, %v636_v22  ;;  %v675_v32 = vsel %vm667_vm5, -1e+30, %v635_v5  ;;  %v1598_v22 = vld [vmem:[%s2067_s4 + $0x38] sm:$0xff]   ;;  %v1600_v5 = vld [vmem:[%s2067_s4 + $0x48] sm:$0xff]  }
 0x288   : > { %v696_v33 = vsel %vm457_vm1, %v676_v31, -inf  ;;  %v693_v34 = vsel %vm457_vm1, %v675_v32, -inf }
 0x289   : > { %697 = vmax.xlane.f32.xlu1 %v696_v33  ;;  %694 = vmax.xlane.f32.xlu0 %v693_v34  ;;  %v661_v38 = vpop.xlane.xlu0 %660 }
 0x28a   : > { %vm669_vm6 = vcmp.ge.f32.partialorder %v637_v9, %v661_v38 }
 0x28b   : > { %v677_v40 = vsel %vm669_vm6, -1e+30, %v637_v9 }
 0x28c   : > { %v699_v43 = vsel %vm457_vm1, %v677_v40, -inf }
 0x28d   : > { %700 = vmax.xlane.f32.xlu0 %v699_v43 }
 0x30a   : > { %v680_v48 = vpop.xlane.xlu1 %679 }
 0x30b   : > { %vm702_vm10 = vcmp.ge.f32.partialorder %v1793_v30, %v680_v48 }
 0x30c   : > { %v1859_v51 = vsel %vm702_vm10, 1.0, %v1621_v50 }
 0x30d   : > { %1549 = vmatprep.mubr.msk.f32.mxu1 %vm457_vm1, %v1859_v51 }
 0x30e   : > { %v686_v52 = vpop.xlane.xlu1 %685  ;;  %v683_v53 = vpop.xlane.xlu0 %682 }
 0x30f   : > { %vm704_vm11 = vcmp.ge.f32.partialorder %v1791_v29, %v686_v52  ;;  %vm703_vm12 = vcmp.ge.f32.partialorder %v1801_v36, %v683_v53 }
 0x310   : > { %v1866_v54 = vsel %vm704_vm11, 1.0, %v1621_v50  ;;  %v1869_v55 = vsel %vm703_vm12, 1.0, %v1621_v50 }
 0x311   : > { %1550 = vmatmul.mubr.msk.f32.vlgmr.msra.gmra.mrb[0].mxu1 %vm457_vm1, %v1869_v55 }
 0x312   : > { %v692_v30 = vpop.xlane.xlu1 %691  ;;  %1552 = vmatprep.mubr.msk.f32.mxu1 %vm457_vm1, %v1866_v54  ;;  %v689_v56 = vpop.xlane.xlu0 %688 }
 0x313   : > { %vm706_vm13 = vcmp.ge.f32.partialorder %v1799_v35, %v692_v30  ;;  %vm705_vm14 = vcmp.ge.f32.partialorder %v1810_v42, %v689_v56 }
 0x314   : > { %v1878_v29 = vsel %vm706_vm13, 1.0, %v1621_v50  ;;  %v1881_v36 = vsel %vm705_vm14, 1.0, %v1621_v50 }
 0x315   : > { %1553 = vmatmul.mubr.msk.f32.gmra.mrb[2].mxu1 %vm457_vm1, %v1881_v36 }
 0x316   : > { %v698_v57 = vpop.xlane.xlu1 %697  ;;  %1555 = vmatprep.mubr.msk.f32.mxu1 %vm457_vm1, %v1878_v29  ;;  %v695_v58 = vpop.xlane.xlu0 %694 }
 0x317   : > { %vm708_vm15 = vcmp.ge.f32.partialorder %v1808_v41, %v698_v57  ;;  %vm707_vm0 = vcmp.ge.f32.partialorder %v1817_v46, %v695_v58  ;;  %v1588_v41 = vld [vmem:[%s339_s26] ss:$8 sps:$4 sm:$0xff]   ;;  %v1590_v46 = vld [vmem:[%s339_s26 + $0x4] ss:$8 sps:$4 sm:$0xff]  }
 0x318   : > { %v1890_v35 = vsel %vm708_vm15, 1.0, %v1621_v50  ;;  %v1893_v42 = vsel %vm707_vm0, 1.0, %v1621_v50  ;;  %1088 = vmatprep.subr.bf16.mxu1 %v1590_v46 }
 0x319   : > { %1556 = vmatmul.mubr.msk.f32.gmra.mrb[4].mxu1 %vm457_vm1, %v1893_v42 }
 0x31a   : > { %1558 = vmatprep.mubr.msk.f32.mxu1 %vm457_vm1, %v1890_v35  ;;  %v701_v59 = vpop.xlane.xlu0 %700  ;;  %1089 = vmatpush1.bf16.msra.mxu1 %v1588_v41 }
 0x31b   : > { %vm709_vm3 = vcmp.ge.f32.partialorder %v1821_v49, %v701_v59  ;;  %1561 = vmatprep.subr.bf16.mxu1 %v1621_v50  ;;  %v1591_v49 = vld [vmem:[%s2067_s4] sm:$0xff]  }
 0x31c   : > { %v1901_v60 = vsel %vm709_vm3, 1.0, %v1621_v50  ;;  %1239 = vmatpush1.bf16.msra.mxu0 %v1591_v49 }
 0x31d   : > { %1559 = vmatmul.mubr.msk.f32.gmra.mrb[6].mxu1 %vm457_vm1, %v1901_v60  ;;  %1240 = vmatprep.subr.bf16.mxu0 %v1619_v2 }
 0x31e   : > { %1120 = vmatprep.mubr.bf16.mxu1 %v1619_v2 }
 0x320   : > { %1241 = vmatpush1.bf16.msra.mxu0 %v1592_v61 }
 0x321   : > { %1242 = vmatprep.subr.bf16.mxu0 %v1619_v2 }
 0x324   : > { %1243 = vmatpush1.bf16.msra.mxu0 %v1593_v62 }
 0x325   : > { %1244 = vmatprep.subr.bf16.mxu0 %v1619_v2 }
 0x328   : > { %1245 = vmatpush1.bf16.msra.mxu0 %v1594_v63 }
 0x329   : > { %1246 = vmatprep.subr.bf16.mxu0 %v1619_v2 }
 0x32c   : > { %1247 = vmatpush1.bf16.msra.mxu0 %v1595_v0 }
 0x32d   : > { %1248 = vmatprep.subr.bf16.mxu0 %v1619_v2 }
 0x330   : > { %1249 = vmatpush1.bf16.msra.mxu0 %v1596_v1 }
 0x331   : > { %1250 = vmatprep.subr.bf16.mxu0 %v1619_v2 }
 0x334   : > { %1251 = vmatpush1.bf16.msra.mxu0 %v1597_v3 }
 0x335   : > { %1252 = vmatprep.subr.bf16.mxu0 %v1619_v2 }
 0x338   : > { %1253 = vmatpush1.bf16.msra.mxu0 %v1598_v22 }
 0x339   : > { %1254 = vmatprep.subr.bf16.mxu0 %v1619_v2 }
 0x33c   : > { %1255 = vmatpush1.bf16.msra.mxu0 %v1599_v4 }
 0x33d   : > { %1256 = vmatprep.subr.bf16.mxu0 %v1619_v2 }
 0x340   : > { %1257 = vmatpush1.bf16.msra.mxu0 %v1600_v5 }
 0x341   : > { %1258 = vmatprep.subr.bf16.mxu0 %v1619_v2 }
 0x344   : > { %1259 = vmatpush1.bf16.msra.mxu0 %v1601_v6 }
 0x345   : > { %1260 = vmatprep.subr.bf16.mxu0 %v1619_v2 }
 0x3e4   : > { %v1551_v7 = vpop.f32.mrb[0].mxu1 }
 0x3e5   : > { %v867_v8 = vand.u32 2147483647, %v1551_v7  ;;  %v1476_v9 = vadd.f32 -1.0, %v1551_v7  ;;  %v1492_v10 = vadd.f32 -2.0, %v1551_v7  ;;  %v827_v11 = vpop.f32.mrb[1].mxu1 }
 0x3e6   : > { %v866_v12 = vand.u32 2147483647, %v827_v11  ;;  %v1475_v13 = vadd.f32 -1.0, %v827_v11  ;;  %v1491_v14 = vadd.f32 -2.0, %v827_v11 }
 0x3e7   : > { %vm875_vm4 = vcmp.lt.f32.partialorder %v867_v8, 0.5  ;;  %v938_v15 = vand.u32 2147483647, %v1476_v9  ;;  %v1008_v16 = vand.u32 2147483647, %v1492_v10 }
 0x3e8   : > { %v1468_v17 = vsel %vm875_vm4, 1.0, %v1621_v50  ;;  %vm874_vm5 = vcmp.lt.f32.partialorder %v866_v12, 0.5  ;;  %v937_v18 = vand.u32 2147483647, %v1475_v13  ;;  %v1007_v19 = vand.u32 2147483647, %v1491_v14 }
 0x3e9   : > { %v899_v20 = vmul.f32 %v1468_v17, %v1869_v55  ;;  %vm946_vm6 = vcmp.lt.f32.partialorder %v938_v15, 0.5  ;;  %vm1016_vm7 = vcmp.lt.f32.partialorder %v1008_v16, 0.5  ;;  %v1467_v2 = vsel %vm874_vm5, 1.0, %v1621_v50  ;;  %v1554_v21 = vpop.f32.mrb[2].mxu1 }
 0x3ea   : > { %v1484_v23 = vsel %vm946_vm6, 1.0, %v1621_v50  ;;  %v1500_v24 = vsel %vm1016_vm7, 1.0, %v1621_v50  ;;  %v898_v25 = vmul.f32 %v1467_v2, %v1859_v51  ;;  %vm945_vm8 = vcmp.lt.f32.partialorder %v937_v18, 0.5  ;;  %v837_v26 = vpop.f32.mrb[3].mxu1 }
 0x3eb   : > { %v907_v27 = vsel %vm457_vm1, %v899_v20, 0.0  ;;  %v970_v28 = vmul.f32 %v1484_v23, %v1869_v55  ;;  %v1040_v31 = vmul.f32 %v1500_v24, %v1869_v55  ;;  %v1483_v32 = vsel %vm945_vm8, 1.0, %v1621_v50 }
 0x3ec   : > { %v906_v33 = vsel %vm457_vm1, %v898_v25, 0.0  ;;  %v969_v34 = vmul.f32 %v1483_v32, %v1859_v51  ;;  %vm1015_vm9 = vcmp.lt.f32.partialorder %v1007_v19, 0.5  ;;  %v869_v37 = vand.u32 2147483647, %v1554_v21  ;;  %v1557_v38 = vpop.f32.mrb[4].mxu1 }
 0x3ed   : > { %v978_v39 = vsel %vm457_vm1, %v970_v28, 0.0  ;;  %v1048_v40 = vsel %vm457_vm1, %v1040_v31, 0.0  ;;  %v908_v43 = vadd.f32 %v907_v27, %v906_v33  ;;  %v1499_v44 = vsel %vm1015_vm9, 1.0, %v1621_v50  ;;  %v847_v45 = vpop.f32.mrb[5].mxu1 }
 0x3ee   : > { %v977_v47 = vsel %vm457_vm1, %v969_v34, 0.0  ;;  %v1039_v48 = vmul.f32 %v1499_v44, %v1859_v51  ;;  %vm877_vm10 = vcmp.lt.f32.partialorder %v869_v37, 0.5  ;;  %v1478_v52 = vadd.f32 -1.0, %v1554_v21 }
 0x3ef   : > { %v979_v53 = vadd.f32 %v978_v39, %v977_v47  ;;  %v1470_v55 = vsel %vm877_vm10, 1.0, %v1621_v50  ;;  %v1494_v30 = vadd.f32 -2.0, %v1554_v21  ;;  %v868_v56 = vand.u32 2147483647, %v837_v26 }
 0x3f0   : > { %v1047_v57 = vsel %vm457_vm1, %v1039_v48, 0.0  ;;  %v940_v58 = vand.u32 2147483647, %v1478_v52  ;;  %v1477_v59 = vadd.f32 -1.0, %v837_v26  ;;  %v1974_v41 = vpop.f32.mrb[6].mxu1  ;;  %v1493_v61 = vadd.f32 -2.0, %v837_v26 }
 0x3f1   : > { %v1049_v46 = vadd.f32 %v1048_v40, %v1047_v57  ;;  %v1010_v49 = vand.u32 2147483647, %v1494_v30  ;;  %vm876_vm11 = vcmp.lt.f32.partialorder %v868_v56, 0.5  ;;  %v1976_v62 = vpop.f32.mrb[7].mxu1  ;;  %v901_v51 = vmul.f32 %v1470_v55, %v1881_v36 }
 0x3f2   : > { %vm948_vm12 = vcmp.lt.f32.partialorder %v940_v58, 0.5  ;;  %v1469_v63 = vsel %vm876_vm11, 1.0, %v1621_v50  ;;  %v939_v0 = vand.u32 2147483647, %v1477_v59  ;;  %v1009_v22 = vand.u32 2147483647, %v1493_v61 }
 0x3f3   : > { %v1486_v1 = vsel %vm948_vm12, 1.0, %v1621_v50  ;;  %vm1018_vm13 = vcmp.lt.f32.partialorder %v1010_v49, 0.5  ;;  %v900_v3 = vmul.f32 %v1469_v63, %v1866_v54  ;;  %v871_v5 = vand.u32 2147483647, %v1557_v38 }
 0x3f4   : > { %v1502_v4 = vsel %vm1018_vm13, 1.0, %v1621_v50  ;;  %vm947_vm14 = vcmp.lt.f32.partialorder %v939_v0, 0.5  ;;  %v972_v6 = vmul.f32 %v1486_v1, %v1881_v36  ;;  %vm1017_vm15 = vcmp.lt.f32.partialorder %v1009_v22, 0.5 }
 0x3f5   : > { %v909_v7 = vsel %vm457_vm1, %v900_v3, 0.0  ;;  %v1485_v8 = vsel %vm947_vm14, 1.0, %v1621_v50  ;;  %v911_v9 = vsel %vm457_vm1, %v901_v51, 0.0  ;;  %v1501_v12 = vsel %vm1017_vm15, 1.0, %v1621_v50 }
 0x3f6   : > { %v910_v10 = vadd.f32 %v909_v7, %v908_v43  ;;  %v971_v11 = vmul.f32 %v1485_v8, %v1866_v54  ;;  %v1042_v13 = vmul.f32 %v1502_v4, %v1881_v36  ;;  %v1041_v14 = vmul.f32 %v1501_v12, %v1866_v54 }
 0x3f7   : > { %vm879_vm0 = vcmp.lt.f32.partialorder %v871_v5, 0.5  ;;  %v1480_v15 = vadd.f32 -1.0, %v1557_v38  ;;  %v1496_v18 = vadd.f32 -2.0, %v1557_v38  ;;  %v870_v19 = vand.u32 2147483647, %v847_v45 }
 0x3f8   : > { %v980_v16 = vsel %vm457_vm1, %v971_v11, 0.0  ;;  %v1472_v17 = vsel %vm879_vm0, 1.0, %v1621_v50  ;;  %v982_v20 = vsel %vm457_vm1, %v972_v6, 0.0  ;;  %v1050_v21 = vsel %vm457_vm1, %v1041_v14, 0.0 }
 0x3f9   : > { %v981_v2 = vadd.f32 %v980_v16, %v979_v53  ;;  %v942_v23 = vand.u32 2147483647, %v1480_v15  ;;  %v1051_v24 = vadd.f32 %v1050_v21, %v1049_v46  ;;  %v1012_v25 = vand.u32 2147483647, %v1496_v18 }
 0x3fa   : > { %vm878_vm3 = vcmp.lt.f32.partialorder %v870_v19, 0.5  ;;  %v912_v36 = vadd.f32 %v911_v9, %v910_v10  ;;  %v903_v54 = vmul.f32 %v1472_v17, %v1893_v42  ;;  %v1479_v27 = vadd.f32 -1.0, %v847_v45 }
 0x3fb   : > { %vm950_vm4 = vcmp.lt.f32.partialorder %v942_v23, 0.5  ;;  %v1471_v26 = vsel %vm878_vm3, 1.0, %v1621_v50  ;;  %vm1020_vm5 = vcmp.lt.f32.partialorder %v1012_v25, 0.5  ;;  %v983_v31 = vadd.f32 %v982_v20, %v981_v2 }
 0x3fc   : > { %v902_v28 = vmul.f32 %v1471_v26, %v1878_v29  ;;  %v1052_v32 = vsel %vm457_vm1, %v1042_v13, 0.0  ;;  %v1488_v33 = vsel %vm950_vm4, 1.0, %v1621_v50  ;;  %v941_v34 = vand.u32 2147483647, %v1479_v27 }
 0x3fd   : > { %v1495_v37 = vadd.f32 -2.0, %v847_v45  ;;  %v1504_v38 = vsel %vm1020_vm5, 1.0, %v1621_v50  ;;  %v1053_v40 = vadd.f32 %v1052_v32, %v1051_v24  ;;  %v873_v43 = vand.u32 2147483647, %v1974_v41 }
 0x3fe   : > { %v913_v39 = vsel %vm457_vm1, %v902_v28, 0.0  ;;  %v915_v44 = vsel %vm457_vm1, %v903_v54, 0.0  ;;  %vm949_vm6 = vcmp.lt.f32.partialorder %v941_v34, 0.5  ;;  %v974_v52 = vmul.f32 %v1488_v33, %v1893_v42 }
 0x3ff   : > { %v914_v47 = vadd.f32 %v913_v39, %v912_v36  ;;  %v1011_v48 = vand.u32 2147483647, %v1495_v37  ;;  %v1487_v53 = vsel %vm949_vm6, 1.0, %v1621_v50  ;;  %vm881_vm7 = vcmp.lt.f32.partialorder %v873_v43, 0.5 }
 0x400   : > { %v1482_v55 = vadd.f32 -1.0, %v1974_v41  ;;  %v1044_v45 = vmul.f32 %v1504_v38, %v1893_v42  ;;  %v973_v30 = vmul.f32 %v1487_v53, %v1878_v29  ;;  %v1498_v56 = vadd.f32 -2.0, %v1974_v41 }
 0x401   : > { %vm1019_vm8 = vcmp.lt.f32.partialorder %v1011_v48, 0.5  ;;  %v1474_v58 = vsel %vm881_vm7, 1.0, %v1621_v50  ;;  %v872_v46 = vand.u32 2147483647, %v1976_v62  ;;  %v916_v63 = vadd.f32 %v915_v44, %v914_v47 }
 0x402   : > { %v1503_v57 = vsel %vm1019_vm8, 1.0, %v1621_v50  ;;  %v944_v59 = vand.u32 2147483647, %v1482_v55  ;;  %v984_v49 = vsel %vm457_vm1, %v973_v30, 0.0  ;;  %v1014_v51 = vand.u32 2147483647, %v1498_v56 }
 0x403   : > { %v1043_v61 = vmul.f32 %v1503_v57, %v1878_v29  ;;  %v985_v0 = vadd.f32 %v984_v49, %v983_v31  ;;  %vm880_vm9 = vcmp.lt.f32.partialorder %v872_v46, 0.5  ;;  %v986_v42 = vsel %vm457_vm1, %v974_v52, 0.0  ;;  %v1602_v46 = vld [vmem:[%s2067_s4 + $0x58] sm:$0xff]   ;;  %v1603_v49 = vld [vmem:[%s2069_s6] sm:$0xff]  }
 0x404   : > { %v1056_v1 = vsel %vm457_vm1, %v1044_v45, 0.0  ;;  %v1473_v3 = vsel %vm880_vm9, 1.0, %v1621_v50  ;;  %v905_v4 = vmul.f32 %v1474_v58, %v1901_v60  ;;  %vm952_vm10 = vcmp.lt.f32.partialorder %v944_v59, 0.5  ;;  %1261 = vmatpush1.bf16.msra.mxu0 %v1602_v46 }
 0x405   : > { %v1054_v41 = vsel %vm457_vm1, %v1043_v61, 0.0  ;;  %v904_v5 = vmul.f32 %v1473_v3, %v1890_v35  ;;  %vm1022_vm11 = vcmp.lt.f32.partialorder %v1014_v51, 0.5  ;;  %v1481_v29 = vadd.f32 -1.0, %v1976_v62  ;;  %v1510_v3 = vld [vmem:[%s2068_s5] ss:$0 sm:$0xff] }
 0x406   : > { %v1055_v22 = vadd.f32 %v1054_v41, %v1053_v40  ;;  %v987_v6 = vadd.f32 %v986_v42, %v985_v0  ;;  %v1497_v7 = vadd.f32 -2.0, %v1976_v62  ;;  %v1490_v10 = vsel %vm952_vm10, 1.0, %v1621_v50  ;;  %v1604_v41 = vld [vmem:[%s2069_s6 + $0x8] sm:$0xff]  }
 0x407   : > { %v917_v8 = vsel %vm457_vm1, %v904_v5, 0.0  ;;  %v943_v12 = vand.u32 2147483647, %v1481_v29  ;;  %v919_v14 = vsel %vm457_vm1, %v905_v4, 0.0  ;;  %v1506_v15 = vsel %vm1022_vm11, 1.0, %v1621_v50 }
 0x408   : > { %v1057_v9 = vadd.f32 %v1056_v1, %v1055_v22  ;;  %v918_v11 = vadd.f32 %v917_v8, %v916_v63  ;;  %v1013_v13 = vand.u32 2147483647, %v1497_v7  ;;  %v976_v17 = vmul.f32 %v1490_v10, %v1901_v60  ;;  %v1524_v8 = vld [vmem:[%s2070_s7] ss:$0 sm:$0xff] }
 0x409   : > { %vm951_vm12 = vcmp.lt.f32.partialorder %v943_v12, 0.5  ;;  %v1046_v19 = vmul.f32 %v1506_v15, %v1901_v60  ;;  %vm1069_vm14 = vcmask 1040384   ;;  %vm1234_vm15 = vcmask 523264  }
 0x40a   : > { %v920_v16 = vadd.f32 %v919_v14, %v918_v11  ;;  %vm1021_vm13 = vcmp.lt.f32.partialorder %v1013_v13, 0.5  ;;  %v1489_v18 = vsel %vm951_vm12, 1.0, %v1621_v50  ;;  %v990_v26 = vsel %vm457_vm1, %v976_v17, 0.0 }
 0x40b   : > { %v1505_v62 = vsel %vm1021_vm13, 1.0, %v1621_v50  ;;  %v975_v2 = vmul.f32 %v1489_v18, %v1890_v35  ;;  %v1060_v27 = vsel %vm457_vm1, %v1046_v19, 0.0  ;;  %vm1346_vm0 = vcmask 1042432  }
 0x40c   : > { %v921_v20 = vrot.slane %v920_v16, 4  ;;  %v1045_v21 = vmul.f32 %v1505_v62, %v1890_v35 }
 0x40d   : > { %v988_v24 = vsel %vm457_vm1, %v975_v2, 0.0 }
 0x40e   : > { %v922_v23 = vadd.f32 %v921_v20, %v920_v16  ;;  %v1058_v25 = vsel %vm457_vm1, %v1045_v21, 0.0  ;;  %v989_v36 = vadd.f32 %v988_v24, %v987_v6 }
 0x40f   : > { %v1059_v54 = vadd.f32 %v1058_v25, %v1057_v9 }
 0x410   : > { %v923_v28 = vrot.slane %v922_v23, 2  ;;  %v991_v31 = vadd.f32 %v990_v26, %v989_v36 }
 0x411   : > { %v1061_v32 = vadd.f32 %v1060_v27, %v1059_v54 }
 0x412   : > { %v924_v60 = vadd.f32 %v923_v28, %v922_v23  ;;  %v992_v33 = vrot.slane %v991_v31, 4 }
 0x413   : > { %v1062_v34 = vrot.slane %v1061_v32, 4 }
 0x414   : > { %v993_v37 = vadd.f32 %v992_v33, %v991_v31  ;;  %v925_v35 = vrot.slane %v924_v60, 1 }
 0x415   : > { %v1063_v38 = vadd.f32 %v1062_v34, %v1061_v32 }
 0x416   : > { %v994_v39 = vrot.slane %v993_v37, 2  ;;  %v926_v47 = vadd.f32 %v925_v35, %v924_v60 }
 0x417   : > { %v1064_v40 = vrot.slane %v1063_v38, 2 }
 0x418   : > { %v995_v43 = vadd.f32 %v994_v39, %v993_v37  ;;  %v928_v45 = vmul.f32 0.015625, %v926_v47 }
 0x419   : > { %v1065_v44 = vadd.f32 %v1064_v40, %v1063_v38 }
 0x41a   : > { %v996_v48 = vrot.slane %v995_v43, 1 }
 0x41b   : > { %v1066_v52 = vrot.slane %v1065_v44, 1 }
 0x41c   : > { %v997_v53 = vadd.f32 %v996_v48, %v995_v43 }
 0x41d   : > { %v1067_v55 = vadd.f32 %v1066_v52, %v1065_v44 }
 0x41e   : > { %v998_v30 = vmul.f32 0.015625, %v997_v53 }
 0x41f   : > { %v1068_v56 = vmul.f32 0.015625, %v1067_v55 }
 0x420   : > { %v1070_v57 = vsel %vm1069_vm14, %v928_v45, %v998_v30 }
 0x421   : > { %v1071_v58 = vsel %vm505_vm2, %v1070_v57, %v1068_v56  ;;  %vm1302_vm2 = vcmask 261120  }
 0x422   : > { %v1074_v59 = vpack.c.bf16 %v1071_v58, %v1071_v58 }
 0x424   : > { %1509 = vmatmul.mubr.msk.bf16.vlgmr.msra.gmra.mrb[8].mxu1 %vm457_vm1, %v1074_v59  ;;  %vm1622_vm1 = vmmov 0  }
 0x425   : > { %1562 = vmatpush3.bf16.msra.mxu1 %v1603_v49  ;;  %1565 = vmatprep.mubr.msk.bf16.mxu1 %vm1622_vm1, %v1621_v50 }
 0x426   : > { %1563 = vmatprep.subr.bf16.mxu1 %v1621_v50 }
 0x429   : > { %1564 = vmatpush3.bf16.msra.mxu1 %v1604_v41 }
 0x4f7   : > { %v1122_v61 = vpop.f32.mrb[8].mxu1 }
 0x4f8   : > { %v1124_v51 = vpop.f32.mrb[9].mxu1  ;;  %v1129_v42 = vpack.c.bf16 %v1122_v61, %v1122_v61 }
 0x4f9   : > { %v1130_v63 = vpack.c.bf16 %v1124_v51, %v1124_v51  ;;  %v1126_v0 = vpop.f32.mrb[10].mxu1 }
 0x4fa   : > { %v1127_v1 = vpop.f32.mrb[11].mxu1 }
 0x4fb   : > { %1523 = vmatprep.mubr.msk.bf16.mxu0 %vm1234_vm15, %v1130_v63 }
 0x4fc   : > { %1271 = vmatmul.mubr.bf16.vlgmr.msra.gmra.mrb[0].mxu0 %v1129_v42 }
 0x5cf   : > { %v1272_v22 = vpop.f32.mrb[0].mxu0 }
 0x5d0   : > { %v1273_v4 = vadd.f32 %v1510_v3, %v1272_v22  ;;  %v1274_v5 = vpop.f32.mrb[1].mxu0 }
 0x5d1   : > { %v1275_v29 = vpop.f32.mrb[2].mxu0 }
 0x5d2   : > { %v1278_v6 = vpack.c.bf16 %v1273_v4, %v1273_v4  ;;  %v1276_v7 = vpop.f32.mrb[3].mxu0 }
 0x5d4   : > { %1566 = vmatmul.mubr.msk.bf16.vlgmr.msra.gmra.mrb[12].mxu1 %vm1302_vm2, %v1278_v6 }
 0x6a7   : > { %v1340_v9 = vpop.f32.mrb[12].mxu1 }
 0x6a8   : > { %v1341_v50 = vadd.f32 %v1524_v8, %v1340_v9  ;;  %v1567_v10 = vpop.f32.mrb[13].mxu1 }
 0x6a9   : > { %v1343_v11 = vpop.f32.mrb[14].mxu1 }
 0x6aa   : > { %v1568_v12 = vpop.f32.mrb[15].mxu1  ;;  %v1347_v13 = vsel %vm1346_vm0, %v1341_v50, -inf }
 0x6ab   : > { %1348 = vmax.xlane.f32.xlu1 %v1347_v13 }
 0x738   : > { %v1349_v14 = vpop.xlane.xlu1 %1348 }
 0x739   : > { %v1350_v15 = vsub.f32 %v1341_v50, %v1349_v14 }
 0x73b   : > { %v1351_v16 = vmul.f32 1.442695, %v1350_v15 }
 0x73d   : > { %1607 = vpow2.f32 %v1351_v16 }
 0x747   : > { %v1608_v17 = vpop.eup %1607 }
 0x748   : > { %v1353_v18 = vsel %vm1346_vm0, %v1608_v17, 0.0 }
 0x749   : > { %1354 = vadd.xlane.f32.xlu0 %v1353_v18 }
 0x7d6   : > { %v1355_v62 = vpop.xlane.xlu0 %1354 }
 0x7d7   : > { %1609 = vrcp.f32 %v1355_v62 }
 0x7e1   : > { %v1610_v19 = vpop.eup %1609 }
 0x7e2   : > { %v1357_v20 = vmul.f32 %v1610_v19, %v1608_v17 }
 0x7e4   : > { %1358 = vst [vmem:[%s343_s22] sm:$0x7] %v1357_v20 }
 0x7e5 PF: > { %s18_s27 = sadd.s32 1, %s1617_s27  }
 0x7e6   : > { %p15_p4 = scmp.ge.s32.totalorder %s18_s27, 4  }
 0x7e8   :  { %17 = sbr.rel (!%p15_p4) target bundleno = 1 (0x1), region = 88 }

</bundles_post_ra>
